<compile_context>
chip_gen: v7x
topology: tpu7x:2x2x1
jax: 0.10.0
libtpu: 0.0.40
codegen_flags: <defaults>
</compile_context>

<pallas_src>
import math
import functools

import jax
import jax.numpy as jnp
from jax import lax
from jax.experimental import pallas as pl
from jax.experimental.pallas import tpu as pltpu

context_length = 128
d_model = 512
num_heads = 8
head_dim = d_model // num_heads  # 64


def _attention_kernel(x_ref, wqkv_ref, o_ref, *, scale):
    # x_ref: (Bt, T, C) block; wqkv_ref: (C, 3*Hd) fused weight (bf16).
    Bt, T, C = x_ref.shape
    Hd = wqkv_ref.shape[1] // 3

    # ---- fused QKV projection: one MXU matmul, bf16 inputs, f32 accumulate ----
    x = x_ref[...].astype(jnp.bfloat16).reshape(Bt * T, C)
    qkv = jnp.dot(x, wqkv_ref[...], preferred_element_type=jnp.float32)
    qkv = qkv.reshape(Bt, T, 3 * Hd)                      # (Bt, T, 3*Hd) f32

    q = qkv[:, :, 0 * Hd:1 * Hd] * scale                  # scale folded into q
    k = qkv[:, :, 1 * Hd:2 * Hd]
    v = qkv[:, :, 2 * Hd:3 * Hd]

    # ---- scores = q k^T : batched contraction over head dim (no explicit .T) ----
    scores = jnp.einsum(
        'bqd,bkd->bqk',
        q.astype(jnp.bfloat16), k.astype(jnp.bfloat16),
        preferred_element_type=jnp.float32)               # (Bt, T, T) f32

    # causal lower-triangular mask (every row keeps its diagonal -> -inf safe)
    row = lax.broadcasted_iota(jnp.int32, (T, T), 0)
    col = lax.broadcasted_iota(jnp.int32, (T, T), 1)
    scores = jnp.where((col <= row)[None, :, :], scores, -jnp.inf)

    # numerically stable softmax in f32 (keep VPU/EUP work out of bf16 for v5e)
    scores = scores - jnp.max(scores, axis=-1, keepdims=True)
    p = jnp.exp(scores)
    p = p * pl.reciprocal(jnp.sum(p, axis=-1, keepdims=True), approx=True)

    # ---- output = P @ V ----
    out = jnp.einsum(
        'bqk,bkd->bqd',
        p.astype(jnp.bfloat16), v.astype(jnp.bfloat16),
        preferred_element_type=jnp.float32)               # (Bt, T, Hd)
    o_ref[...] = out.astype(o_ref.dtype)


def _pick_batch_block(B, max_bt=8, min_grid=2):
    """Largest Bt (<= max_bt) dividing B that still leaves >= min_grid steps
    (keeps both v7x TensorCores fed). Falls back to Bt=1."""
    best = 1
    for bt in range(1, min(B, max_bt) + 1):
        if B % bt == 0 and (B // bt) >= min_grid:
            best = bt
    return best


def attention(x, wq, wk, wv):
    """x: (B, T, C) float32; wq/wk/wv: (head_dim, d_model) PyTorch-style weights."""
    B, T, C = x.shape
    assert C == d_model and T <= context_length

    # Fuse [Wq | Wk | Wv] into a single (C, 3*Hd) operand; bf16 MXU inputs.
    wqkv = jnp.concatenate([wq.T, wk.T, wv.T], axis=1).astype(jnp.bfloat16)

    Bt = _pick_batch_block(B)
    grid = (B // Bt,)
    scale = 1.0 / math.sqrt(head_dim)
    kernel = functools.partial(_attention_kernel, scale=scale)

    flops = 2 * B * T * C * (3 * head_dim) + 2 * (2 * B * T * T * head_dim)
    bytes_accessed = (B * T * C * 4) + (C * 3 * head_dim * 2) + (B * T * head_dim * 4)

    return pl.pallas_call(
        kernel,
        out_shape=jax.ShapeDtypeStruct((B, T, head_dim), x.dtype),
        grid_spec=pltpu.PrefetchScalarGridSpec(
            num_scalar_prefetch=0,
            grid=grid,
            in_specs=[
                pl.BlockSpec((Bt, T, C), lambda b: (b, 0, 0)),
                pl.BlockSpec((C, 3 * head_dim), lambda b: (0, 0)),  # grid-invariant
            ],
            out_specs=pl.BlockSpec((Bt, T, head_dim), lambda b: (b, 0, 0)),
        ),
        compiler_params=pltpu.CompilerParams(
            dimension_semantics=("parallel",),
        ),
        cost_estimate=pl.CostEstimate(
            flops=flops,
            transcendentals=B * T * T,
            bytes_accessed=bytes_accessed,
        ),
    )(x, wqkv)


def _reference(x, wq, wk, wv):
    # pure-JAX f32 reference with identical semantics (dropout in eval mode)
    q = x @ wq.T
    k = x @ wk.T
    v = x @ wv.T
    w = (q @ jnp.swapaxes(k, -2, -1)) / math.sqrt(head_dim)
    T = x.shape[1]
    mask = jnp.tril(jnp.ones((T, T), dtype=bool))
    w = jnp.where(mask, w, -jnp.inf)
    w = jax.nn.softmax(w, axis=-1)
    return w @ v


if __name__ == "__main__":
    key = jax.random.PRNGKey(0)
    kx, kq, kk, kv = jax.random.split(key, 4)

    B, T = 2, 128  # T = context_length; any T <= 128 is legal for the module
    x = jax.random.normal(kx, (B, T, d_model), dtype=jnp.float32)

    # deterministic init mimicking nn.Linear's kaiming-uniform bound
    bound = 1.0 / math.sqrt(d_model)
    wq = jax.random.uniform(kq, (head_dim, d_model), jnp.float32, -bound, bound)
    wk = jax.random.uniform(kk, (head_dim, d_model), jnp.float32, -bound, bound)
    wv = jax.random.uniform(kv, (head_dim, d_model), jnp.float32, -bound, bound)

    out = attention(x, wq, wk, wv)
    out = jax.block_until_ready(out)

    ref = _reference(x, wq, wk, wv)
    assert out.shape == (B, T, head_dim)
    # bf16 MXU inputs + approx reciprocal -> relaxed tolerance vs f32 reference
    assert jnp.allclose(out, ref, atol=3e-2, rtol=3e-2), "mismatch vs reference"

    print("KERNEL_OK")
</pallas_src>

<mosaic_0001>
module attributes {stable_mosaic.version = 11 : i64} {
  func.func @_attention_kernel(%arg0: i32, %arg1: memref<1x128x512xf32, #tpu.memory_space<vmem>>, %arg2: memref<512x192xbf16, #tpu.memory_space<vmem>>, %arg3: memref<1x128x64xf32, #tpu.memory_space<vmem>>) attributes {dimension_semantics = [#tpu.dimension_semantics<parallel>], iteration_bounds = array<i64: 2>, scalar_prefetch = 0 : i64, scratch_operands = 0 : i64, tpu.core_type = #tpu.core_type<tc>, window_params = [{transform_indices = @transform_0, window_bounds = array<i64: 1, 128, 512>}, {pipeline_mode = #tpu.pipeline_mode<synchronous>, transform_indices = @transform_1, window_bounds = array<i64: 512, 192>}, {transform_indices = @transform_2, window_bounds = array<i64: 1, 128, 64>}]} {
    %c0 = arith.constant 0 : index
    %c0_0 = arith.constant 0 : index
    %c0_1 = arith.constant 0 : index
    %0 = vector.load %arg1[%c0, %c0_0, %c0_1] : memref<1x128x512xf32, #tpu.memory_space<vmem>>, vector<1x128x512xf32>
    %1 = arith.truncf %0 : vector<1x128x512xf32> to vector<1x128x512xbf16>
    %2 = vector.shape_cast %1 : vector<1x128x512xbf16> to vector<128x512xbf16>
    %c0_2 = arith.constant 0 : index
    %c0_3 = arith.constant 0 : index
    %3 = vector.load %arg2[%c0_2, %c0_3] : memref<512x192xbf16, #tpu.memory_space<vmem>>, vector<512x192xbf16>
    %cst = arith.constant dense<0.000000e+00> : vector<128x192xf32>
    %4 = tpu.matmul %2, %3, %cst {dimension_numbers = #tpu.dot_dimension_numbers<[1], [0], [0], [1], [0, 0, 1, 1], [], []>} : vector<128x512xbf16>, vector<512x192xbf16>, vector<128x192xf32> -> vector<128x192xf32>
    %5 = vector.shape_cast %4 : vector<128x192xf32> to vector<1x128x192xf32>
    %6 = vector.extract_strided_slice %5 {offsets = [0, 0, 0], sizes = [1, 128, 64], strides = [1, 1, 1]} : vector<1x128x192xf32> to vector<1x128x64xf32>
    %cst_4 = arith.constant 1.250000e-01 : f32
    %7 = vector.broadcast %cst_4 : f32 to vector<1x128x64xf32>
    %8 = arith.mulf %6, %7 : vector<1x128x64xf32>
    %9 = vector.extract_strided_slice %5 {offsets = [0, 0, 64], sizes = [1, 128, 64], strides = [1, 1, 1]} : vector<1x128x192xf32> to vector<1x128x64xf32>
    %10 = vector.extract_strided_slice %5 {offsets = [0, 0, 128], sizes = [1, 128, 64], strides = [1, 1, 1]} : vector<1x128x192xf32> to vector<1x128x64xf32>
    %11 = arith.truncf %8 : vector<1x128x64xf32> to vector<1x128x64xbf16>
    %12 = arith.truncf %9 : vector<1x128x64xf32> to vector<1x128x64xbf16>
    "tpu.trace_start"() <{level = 10 : i32, message = "bqd,bkd->bqk"}> : () -> ()
    %cst_5 = arith.constant dense<0.000000e+00> : vector<1x128x128xf32>
    %13 = tpu.matmul %11, %12, %cst_5 {dimension_numbers = #tpu.dot_dimension_numbers<[2], [2], [1], [1], [0, 0, 0, 1, 1, 1], [0], [0]>} : vector<1x128x64xbf16>, vector<1x128x64xbf16>, vector<1x128x128xf32> -> vector<1x128x128xf32>
    "tpu.trace_stop"() : () -> ()
    %14 = tpu.iota {dimensions = array<i32: 0>} : vector<128x128xi32>
    %15 = tpu.iota {dimensions = array<i32: 1>} : vector<128x128xi32>
    %16 = arith.cmpi sle, %15, %14 : vector<128x128xi32>
    %17 = vector.shape_cast %16 : vector<128x128xi1> to vector<1x128x128xi1>
    %cst_6 = arith.constant 0xFF800000 : f32
    %18 = vector.broadcast %cst_6 : f32 to vector<1x128x128xf32>
    %19 = arith.select %17, %13, %18 : vector<1x128x128xi1>, vector<1x128x128xf32>
    %cst_7 = arith.constant dense<0xFF800000> : vector<1x128xf32>
    %20 = vector.multi_reduction <maximumf>, %19, %cst_7 [2] : vector<1x128x128xf32> to vector<1x128xf32>
    %21 = vector.shape_cast %20 : vector<1x128xf32> to vector<1x128x1xf32>
    %22 = vector.broadcast %21 : vector<1x128x1xf32> to vector<1x128x128xf32>
    %23 = arith.subf %19, %22 : vector<1x128x128xf32>
    %24 = math.exp %23 : vector<1x128x128xf32>
    %cst_8 = arith.constant dense<0.000000e+00> : vector<1x128xf32>
    %25 = vector.multi_reduction <add>, %24, %cst_8 [2] : vector<1x128x128xf32> to vector<1x128xf32>
    %26 = vector.shape_cast %25 : vector<1x128xf32> to vector<1x128x1xf32>
    %27 = tpu.reciprocal %26 {approx = true} : vector<1x128x1xf32> -> vector<1x128x1xf32>
    %28 = vector.broadcast %27 : vector<1x128x1xf32> to vector<1x128x128xf32>
    %29 = arith.mulf %24, %28 : vector<1x128x128xf32>
    %30 = arith.truncf %29 : vector<1x128x128xf32> to vector<1x128x128xbf16>
    %31 = arith.truncf %10 : vector<1x128x64xf32> to vector<1x128x64xbf16>
    "tpu.trace_start"() <{level = 10 : i32, message = "bqk,bkd->bqd"}> : () -> ()
    %cst_9 = arith.constant dense<0.000000e+00> : vector<1x128x64xf32>
    %32 = tpu.matmul %30, %31, %cst_9 {dimension_numbers = #tpu.dot_dimension_numbers<[2], [1], [1], [2], [0, 0, 0, 1, 1, 2], [0], [0]>} : vector<1x128x128xbf16>, vector<1x128x64xbf16>, vector<1x128x64xf32> -> vector<1x128x64xf32>
    "tpu.trace_stop"() : () -> ()
    %c0_10 = arith.constant 0 : index
    %c0_11 = arith.constant 0 : index
    %c0_12 = arith.constant 0 : index
    %33 = vector.load %arg3[%c0_10, %c0_11, %c0_12] : memref<1x128x64xf32, #tpu.memory_space<vmem>>, vector<1x128x64xf32>
    tpu.vector_store %arg3[%c0_10, %c0_11, %c0_12], %32 {strides = array<i32>} : memref<1x128x64xf32, #tpu.memory_space<vmem>>, vector<1x128x64xf32>,
    return
  }
  func.func @transform_0(%arg0: i32) -> (i32, i32, i32) {
    %c0_i32 = arith.constant 0 : i32
    %c0_i32_0 = arith.constant 0 : i32
    %c0_i32_1 = arith.constant 0 : i32
    return %arg0, %c0_i32, %c0_i32_0 : i32, i32, i32
  }
  func.func @transform_1(%arg0: i32) -> (i32, i32) {
    %c0_i32 = arith.constant 0 : i32
    %c0_i32_0 = arith.constant 0 : i32
    %c0_i32_1 = arith.constant 0 : i32
    return %c0_i32, %c0_i32_0 : i32, i32
  }
  func.func @transform_2(%arg0: i32) -> (i32, i32, i32) {
    %c0_i32 = arith.constant 0 : i32
    %c0_i32_0 = arith.constant 0 : i32
    %c0_i32_1 = arith.constant 0 : i32
    return %arg0, %c0_i32, %c0_i32_0 : i32, i32, i32
  }
}

</mosaic_0001>

<bundles_post_ra>
// kernel: tpu_custom_call.1
= control target key start
LH: loop header
LB: loop body
LE: loop exit
PB: predicated region body
PF: predicated region fallthrough
CT: control target
= control target key end

     0   :  { %7 = vsyncpa [#allocation3], 0  ;;  %s2648_s0 = inlined_call_operand.hbm [shape: f32[2,128,512], index: 0, kind: input, shape index: {}]   ;;  %s2649_s1 = inlined_call_operand.vmem [shape: bf16[512,192], index: 1, kind: input, shape index: {}]   ;;  %s2650_s2 = inlined_call_operand.vmem [shape: f32[2,128,64], index: 2, kind: output, shape index: {}]  }
   0x1   :  { %9 = vsyncpa [#allocation3 + $0x1], 0  ;;  %s1973_s9 = smov 0   ;;  %s1975_s10 = smov 0  }
   0x2   :  { %s1977_s11 = smov 0   ;;  %s1979_s12 = smov 0  }
   0x3 LB: > { %s1992_s13 = sadd.s32 4294967295, %s1952_s12   ;;  %s1995_s14 = sadd.s32 1, %s1952_s12   ;;  %s1952_s12 = sphi %s1979_s12, %s2657_s12   ;;  %s1948_s11 = sphi %s1977_s11, %s2656_s11   ;;  %s1944_s10 = sphi %s1975_s10, %s2655_s10   ;;  %s1940_s9 = sphi %s1973_s9, %s2654_s9  }
   0x4   : > { %s19_s15 = ssub.s32 %s1952_s12, %s1995_s14  ;;  %s22_s16 = sadd.s32 1, %s1948_s11 }
   0x5   : > { %p20_p0 = scmp.eq.s32.totalorder %s19_s15, 0  ;;  %p29_p1 = scmp.ne.s32.totalorder %s1948_s11, %s1944_s10 }
   0x6   : > { %p30_p2 = scmp.eq.s32.totalorder %s1952_s12, 0  ;;  %p35_p3 = scmp.ne.s32.totalorder %s1944_s10, %s1940_s9 }
   0x7   : > { %s2005_s17 = scalar_select %p20_p0, %s1948_s11, %s22_s16  }
   0x8   : > { %p31_p4 = por %p30_p2, %p29_p1  ;;  %p36_p5 = scmp.eq.s32.totalorder %s1992_s13, 0 }
   0x9   : > { %p1692_p6 = scmp.lt.s32.totalorder %s1952_s12, 2  ;;  %s109_s19 = sand.u32 1, %s1948_s11  }
   0xa   : > { %p2009_p7 = por %p36_p5, %p35_p3  ;;  %s1467_s20 = sshll.u32 %s109_s19, 9 }
   0xb   : > { %s1548_s21 = sshll.u32 %s1952_s12, 13  ;;  %s113_s25 = scalar_lea.vmem [#allocation2], %s1467_s20 }
   0xc   : > { %s2018_s24 = scalar_lea.hbm %s2648_s0, %s1548_s21  ;;  %s120_s26 = sshll.u32 %s113_s25, 4  ;;  %s2020_s26 = int_to_ptr.vmem [resolvable:$true] %s120_s26 }
   0xd   : > { %p2022_p8 = pnand %p1692_p6, %p31_p4  ;;  %s2027_s28 = scalar_lea.sflag [#allocation3], %s109_s19 }
   0xe   : > { %s1888_s29 = scalar_lea.hbm %s2018_s24, 8192  ;;  %s1893_s4 = scalar_lea.hbm %s2648_s0, 16384 }
   0xf   : > { %p1889_p10 = scmp.ne.s32.totalorder %s2018_s24, %s1888_s29  ;;  %p1890_p11 = pneg %p2022_p8 }
  0x10   : > { %p1894_p0 = scmp.lt.u32.totalorder %s2018_s24, %s2648_s0  ;;  %p1895_p1 = scmp.lt.u32.totalorder %s1893_s4, %s1888_s29 }
  0x11   : > { %p1891_p12 = pnand %p1890_p11, %p1889_p10  ;;  %p1897_p3 = scmp.lt.u32.totalorder %s1888_s29, %s2018_s24 }
  0x12   : > { %p1896_p2 = por %p1895_p1, %p1894_p0 }
  0x13   : > { %p1892_p13 = pneg %p1891_p12 }
  0x14   : > { %p1898_p4 = por %p1897_p3, %p1896_p2 }
  0x16   : > { %p1899_p5 = pnand %p1898_p4, %p1892_p13 }
  0x18   : > { %1902 = shalt.err (!%p1899_p5)
}
  0x19   : > { %s1903_s7 = scalar_lea.vmem %s2020_s26, 8192  ;;  %s1954_s8 = smov [#allocation2]  }
  0x1a   : > { %p1904_p6 = scmp.ne.s32.totalorder %s2020_s26, %s1903_s7  ;;  %s1908_s9 = sshll.u32 %s1954_s8, 4  ;;  %s1909_s9 = int_to_ptr.vmem [resolvable:$false] %s1908_s9 }
  0x1b   : > { %s1910_s15 = scalar_lea.vmem %s1909_s9, 16384  ;;  %p1911_p9 = scmp.lt.s32.totalorder %s2020_s26, %s1909_s9 }
  0x1c   : > { %p1906_p10 = pnand %p1904_p6, %p1890_p11  ;;  %p1912_p0 = scmp.lt.s32.totalorder %s1910_s15, %s1903_s7 }
  0x1e   : > { %p1907_p12 = pneg %p1906_p10  ;;  %p1913_p1 = por %p1912_p0, %p1911_p9 }
  0x20   : > { %p1914_p2 = pnand %p1913_p1, %p1907_p12 }
  0x22   : > { %1917 = shalt.err (!%p1914_p2)
}
  0x23   : > { %s1955_s16 = smov 512   ;;  %s1956_s19 = smov 32  }
  0x24   : > { %1691 = dma.hbm_to_vmem [thread:$0]  (!%p2022_p8), %s2018_s24, 8192, %s2020_s26, %s2027_s28, %s1955_s16, %s1955_s16, %s1956_s19  }
  0x25   : > { %p128_p11 = scmp.lt.s32.totalorder %s1952_s12, 3  ;;  %p2653_p13 = scmp.ge.s32.totalorder %s1952_s12, 1 }
  0x27   : > { %p129_p3 = pnand %p2653_p13, %p128_p11 }
  0x28   : > { %s134_s20 = sand.u32 (!%p129_p3), 1, %s1944_s10  }
  0x29   : > { %132 = sbr.rel (%p129_p3) target bundleno = 1351 (0x547), region = 28  ;;  %s1471_s21 = sshll.u32 (!%p129_p3), %s134_s20, 9 }
  0x2a   : > { %s135_s22 = scalar_lea.sflag (!%p129_p3), [#allocation3], %s134_s20  ;;  %s2059_s23 = scalar_lea.vmem (!%p129_p3), [#allocation2], %s1471_s21 }
  0x30   : > { %1935 = dma.done.wait (%p2009_p7), %s135_s22, 8192  }
  0x31   : > { %1937 = vsyncadd (%p2009_p7), %s135_s22, 4294959104  ;;  %v1728_v0 = vld [vmem:[%s2649_s1 + $0x4] ss:$8 sps:$4 sm:$0xff]   ;;  %v1730_v1 = vld [vmem:[%s2649_s1] ss:$8 sps:$4 sm:$0xff]   ;;  %vm927_vm0 = vcmask 523264  }
  0x32   : > { %645 = vmatprep.subr.bf16.mxu0 %v1728_v0  ;;  %v1731_v2 = vld [vmem:[%s2649_s1 + $0x14] ss:$8 sps:$4 sm:$0xff]   ;;  %v1733_v3 = vld [vmem:[%s2649_s1 + $0x10] ss:$8 sps:$4 sm:$0xff]   ;;  %v1734_v4 = vld [vmem:[%s2649_s1 + $0x24] ss:$8 sps:$4 sm:$0xff]  }
  0x33   : > { %646 = vmatpush1.bf16.msra.mxu0 %v1730_v1  ;;  %v1736_v5 = vld [vmem:[%s2649_s1 + $0x20] ss:$8 sps:$4 sm:$0xff]   ;;  %v1737_v6 = vld [vmem:[%s2649_s1 + $0x34] ss:$8 sps:$4 sm:$0xff]   ;;  %v1739_v7 = vld [vmem:[%s2649_s1 + $0x30] ss:$8 sps:$4 sm:$0xff]  }
  0x34   : > { %647 = vmatprep.subr.bf16.mxu0 %v1731_v2  ;;  %v1740_v8 = vld [vmem:[%s2649_s1 + $0x44] ss:$8 sps:$4 sm:$0xff]   ;;  %v1742_v9 = vld [vmem:[%s2649_s1 + $0x40] ss:$8 sps:$4 sm:$0xff]   ;;  %v1743_v10 = vld [vmem:[%s2649_s1 + $0x54] ss:$8 sps:$4 sm:$0xff]  }
  0x35   : > { %v1745_v11 = vld [vmem:[%s2649_s1 + $0x50] ss:$8 sps:$4 sm:$0xff]   ;;  %v1746_v12 = vld [vmem:[%s2649_s1 + $0x64] ss:$8 sps:$4 sm:$0xff]   ;;  %v1748_v16 = vld [vmem:[%s2649_s1 + $0x60] ss:$8 sps:$4 sm:$0xff]  }
  0x36   : > { %v166_v13 = vld [vmem:[%s2059_s23 + $0x8] sm:$0xff]  ;;  %v1749_v17 = vld [vmem:[%s2649_s1 + $0x74] ss:$8 sps:$4 sm:$0xff]   ;;  %v1751_v18 = vld [vmem:[%s2649_s1 + $0x70] ss:$8 sps:$4 sm:$0xff]   ;;  %s1957_s19 = smov 64  }
  0x37   : > { %648 = vmatpush1.bf16.msra.mxu0 %v1733_v3  ;;  %v170_v14 = vld [vmem:[%s2059_s23 + $0x28] sm:$0xff]  ;;  %v1755_v21 = vld [vmem:[%s2649_s1 + $0x94] ss:$8 sps:$4 sm:$0xff]   ;;  %v1757_v22 = vld [vmem:[%s2649_s1 + $0x90] ss:$8 sps:$4 sm:$0xff]   ;;  %p159_p7 = scmp.lt.s32.totalorder %s1992_s13, 1 }
  0x38   : > { %649 = vmatprep.subr.bf16.mxu0 %v1734_v4  ;;  %v230_v15 = vpack.c.bf16 %v170_v14, %v166_v13  ;;  %v1752_v19 = vld [vmem:[%s2649_s1 + $0x84] ss:$8 sps:$4 sm:$0xff]   ;;  %v1754_v20 = vld [vmem:[%s2649_s1 + $0x80] ss:$8 sps:$4 sm:$0xff]   ;;  %v1761_v25 = vld [vmem:[%s2649_s1 + $0xb4] ss:$8 sps:$4 sm:$0xff]  }
  0x39   : > { %v1758_v23 = vld [vmem:[%s2649_s1 + $0xa4] ss:$8 sps:$4 sm:$0xff]   ;;  %v1760_v24 = vld [vmem:[%s2649_s1 + $0xa0] ss:$8 sps:$4 sm:$0xff]   ;;  %v1763_v26 = vld [vmem:[%s2649_s1 + $0xb0] ss:$8 sps:$4 sm:$0xff]  }
  0x3a   : > { %677 = vmatprep.mubr.bf16.mxu0 %v230_v15  ;;  %v1764_v27 = vld [vmem:[%s2649_s1 + $0xc4] ss:$8 sps:$4 sm:$0xff]   ;;  %v1766_v28 = vld [vmem:[%s2649_s1 + $0xc0] ss:$8 sps:$4 sm:$0xff]   ;;  %v1767_v29 = vld [vmem:[%s2649_s1 + $0xd4] ss:$8 sps:$4 sm:$0xff]  }
  0x3b   : > { %650 = vmatpush1.bf16.msra.mxu0 %v1736_v5  ;;  %v1769_v30 = vld [vmem:[%s2649_s1 + $0xd0] ss:$8 sps:$4 sm:$0xff]   ;;  %v1770_v31 = vld [vmem:[%s2649_s1 + $0xe4] ss:$8 sps:$4 sm:$0xff]   ;;  %v1772_v32 = vld [vmem:[%s2649_s1 + $0xe0] ss:$8 sps:$4 sm:$0xff]  }
  0x3c   : > { %651 = vmatprep.subr.bf16.mxu0 %v1737_v6  ;;  %v1773_v33 = vld [vmem:[%s2649_s1 + $0xf4] ss:$8 sps:$4 sm:$0xff]   ;;  %v1775_v34 = vld [vmem:[%s2649_s1 + $0xf0] ss:$8 sps:$4 sm:$0xff]   ;;  %v165_v35 = vld [vmem:[%s2059_s23] sm:$0xff]  ;;  %s2659_s13 = smov (!%p159_p7, %s1992_s13), 1 }
  0x3d   : > { %v169_v36 = vld [vmem:[%s2059_s23 + $0x20] sm:$0xff]  ;;  %v174_v38 = vld [vmem:[%s2059_s23 + $0x48] sm:$0xff]  ;;  %v1781_v43 = vld [vmem:[%s2649_s1 + $0x114] ss:$8 sps:$4 sm:$0xff]  }
  0x3e   : > { %v1778_v37 = vld [vmem:[%s2649_s1 + $0x104] ss:$8 sps:$4 sm:$0xff]   ;;  %v229_v40 = vpack.c.bf16 %v169_v36, %v165_v35  ;;  %v1776_v41 = vld [vmem:[%s2649_s1 + $0x100] ss:$8 sps:$4 sm:$0xff]   ;;  %v1779_v44 = vld [vmem:[%s2649_s1 + $0x110] ss:$8 sps:$4 sm:$0xff]  }
  0x3f   : > { %652 = vmatpush1.bf16.msra.mxu0 %v1739_v7  ;;  %v178_v39 = vld [vmem:[%s2059_s23 + $0x68] sm:$0xff]  ;;  %v173_v45 = vld [vmem:[%s2059_s23 + $0x40] sm:$0xff]  ;;  %v1787_v53 = vld [vmem:[%s2649_s1 + $0x134] ss:$8 sps:$4 sm:$0xff]  }
  0x40   : > { %653 = vmatprep.subr.bf16.mxu0 %v1740_v8  ;;  %v234_v42 = vpack.c.bf16 %v178_v39, %v174_v38  ;;  %v177_v46 = vld [vmem:[%s2059_s23 + $0x60] sm:$0xff]  ;;  %v182_v48 = vld [vmem:[%s2059_s23 + $0x88] sm:$0xff]  ;;  %v1785_v54 = vld [vmem:[%s2649_s1 + $0x130] ss:$8 sps:$4 sm:$0xff]  }
  0x41   : > { %v1784_v47 = vld [vmem:[%s2649_s1 + $0x124] ss:$8 sps:$4 sm:$0xff]   ;;  %v233_v50 = vpack.c.bf16 %v177_v46, %v173_v45  ;;  %v1782_v51 = vld [vmem:[%s2649_s1 + $0x120] ss:$8 sps:$4 sm:$0xff]   ;;  %v1793_v63 = vld [vmem:[%s2649_s1 + $0x154] ss:$8 sps:$4 sm:$0xff]  }
  0x42   : > { %v186_v49 = vld [vmem:[%s2059_s23 + $0xa8] sm:$0xff]  ;;  %v181_v55 = vld [vmem:[%s2059_s23 + $0x80] sm:$0xff]  ;;  %v1791_v0 = vld [vmem:[%s2649_s1 + $0x150] ss:$8 sps:$4 sm:$0xff]  }
  0x43   : > { %654 = vmatpush1.bf16.msra.mxu0 %v1742_v9  ;;  %v238_v52 = vpack.c.bf16 %v186_v49, %v182_v48  ;;  %v185_v56 = vld [vmem:[%s2059_s23 + $0xa0] sm:$0xff]  ;;  %v190_v58 = vld [vmem:[%s2059_s23 + $0xc8] sm:$0xff]  ;;  %v1799_v9 = vld [vmem:[%s2649_s1 + $0x174] ss:$8 sps:$4 sm:$0xff]  }
  0x44   : > { %655 = vmatprep.subr.bf16.mxu0 %v1743_v10  ;;  %v1790_v57 = vld [vmem:[%s2649_s1 + $0x144] ss:$8 sps:$4 sm:$0xff]   ;;  %v237_v60 = vpack.c.bf16 %v185_v56, %v181_v55  ;;  %v1788_v61 = vld [vmem:[%s2649_s1 + $0x140] ss:$8 sps:$4 sm:$0xff]   ;;  %v1797_v10 = vld [vmem:[%s2649_s1 + $0x170] ss:$8 sps:$4 sm:$0xff]  }
  0x45   : > { %v194_v59 = vld [vmem:[%s2059_s23 + $0xe8] sm:$0xff]  ;;  %v189_v1 = vld [vmem:[%s2059_s23 + $0xc0] sm:$0xff]  ;;  %v1817_v39 = vld [vmem:[%s2649_s1 + $0x1d4] ss:$8 sps:$4 sm:$0xff]  }
  0x46   : > { %v242_v62 = vpack.c.bf16 %v194_v59, %v190_v58  ;;  %v193_v2 = vld [vmem:[%s2059_s23 + $0xe0] sm:$0xff]  ;;  %v198_v4 = vld [vmem:[%s2059_s23 + $0x108] sm:$0xff]  ;;  %v172_v45 = vld [vmem:[%s2059_s23 + $0x38] sm:$0xff] }
  0x47   : > { %656 = vmatpush1.bf16.msra.mxu0 %v1745_v11  ;;  %v1796_v3 = vld [vmem:[%s2649_s1 + $0x164] ss:$8 sps:$4 sm:$0xff]   ;;  %v241_v6 = vpack.c.bf16 %v193_v2, %v189_v1  ;;  %v1794_v7 = vld [vmem:[%s2649_s1 + $0x160] ss:$8 sps:$4 sm:$0xff]   ;;  %v1823_v49 = vld [vmem:[%s2649_s1 + $0x1f4] ss:$8 sps:$4 sm:$0xff]  }
  0x48   : > { %657 = vmatprep.subr.bf16.mxu0 %v1746_v12  ;;  %v202_v5 = vld [vmem:[%s2059_s23 + $0x128] sm:$0xff]  ;;  %v197_v11 = vld [vmem:[%s2059_s23 + $0x100] sm:$0xff]  ;;  %v179_v58 = vld [vmem:[%s2059_s23 + $0x70] sm:$0xff] }
  0x49   : > { %v246_v8 = vpack.c.bf16 %v202_v5, %v198_v4  ;;  %v201_v12 = vld [vmem:[%s2059_s23 + $0x120] sm:$0xff]  ;;  %v206_v14 = vld [vmem:[%s2059_s23 + $0x148] sm:$0xff]  ;;  %v184_v59 = vld [vmem:[%s2059_s23 + $0x98] sm:$0xff] }
  0x4a   : > { %v1802_v13 = vld [vmem:[%s2649_s1 + $0x184] ss:$8 sps:$4 sm:$0xff]   ;;  %v192_v1 = vld [vmem:[%s2059_s23 + $0xd8] sm:$0xff]  ;;  %v191_v5 = vld [vmem:[%s2059_s23 + $0xd0] sm:$0xff] }
  0x4b   : > { %658 = vmatpush1.bf16.msra.mxu0 %v1748_v16  ;;  %v210_v15 = vld [vmem:[%s2059_s23 + $0x168] sm:$0xff]  ;;  %v245_v16 = vpack.c.bf16 %v201_v12, %v197_v11  ;;  %v196_v2 = vld [vmem:[%s2059_s23 + $0xf8] sm:$0xff]  ;;  %v199_v11 = vld [vmem:[%s2059_s23 + $0x110] sm:$0xff] }
  0x4c   : > { %659 = vmatprep.subr.bf16.mxu0 %v1749_v17  ;;  %v1800_v17 = vld [vmem:[%s2649_s1 + $0x180] ss:$8 sps:$4 sm:$0xff]   ;;  %v244_v4 = vpack.c.bf16 %v196_v2, %v192_v1  ;;  %v203_v12 = vld [vmem:[%s2059_s23 + $0x130] sm:$0xff] }
  0x4d   : > { %v226_v35 = vld [vmem:[%s2059_s23 + $0x1e8] sm:$0xff] }
  0x4f   : > { %660 = vmatpush1.bf16.msra.mxu0 %v1751_v18  ;;  %v250_v18 = vpack.c.bf16 %v210_v15, %v206_v14  ;;  %v212_v14 = vld [vmem:[%s2059_s23 + $0x178] sm:$0xff]  ;;  %v247_v15 = vpack.c.bf16 %v203_v12, %v199_v11 }
  0x50   : > { %661 = vmatprep.subr.bf16.mxu0 %v1752_v19  ;;  %v1805_v19 = vld [vmem:[%s2649_s1 + $0x194] ss:$8 sps:$4 sm:$0xff]  }
  0x53   : > { %662 = vmatpush1.bf16.msra.mxu0 %v1754_v20  ;;  %v1803_v20 = vld [vmem:[%s2649_s1 + $0x190] ss:$8 sps:$4 sm:$0xff]  }
  0x54   : > { %663 = vmatprep.subr.bf16.mxu0 %v1755_v21  ;;  %v205_v21 = vld [vmem:[%s2059_s23 + $0x140] sm:$0xff] }
  0x57   : > { %664 = vmatpush1.bf16.msra.mxu0 %v1757_v22  ;;  %v209_v22 = vld [vmem:[%s2059_s23 + $0x160] sm:$0xff] }
  0x58   : > { %665 = vmatprep.subr.bf16.mxu0 %v1758_v23  ;;  %v1808_v23 = vld [vmem:[%s2649_s1 + $0x1a4] ss:$8 sps:$4 sm:$0xff]  }
  0x5b   : > { %666 = vmatpush1.bf16.msra.mxu0 %v1760_v24  ;;  %v214_v24 = vld [vmem:[%s2059_s23 + $0x188] sm:$0xff] }
  0x5c   : > { %667 = vmatprep.subr.bf16.mxu0 %v1761_v25  ;;  %v218_v25 = vld [vmem:[%s2059_s23 + $0x1a8] sm:$0xff] }
  0x5f   : > { %668 = vmatpush1.bf16.msra.mxu0 %v1763_v26  ;;  %v249_v26 = vpack.c.bf16 %v209_v22, %v205_v21 }
  0x60   : > { %669 = vmatprep.subr.bf16.mxu0 %v1764_v27  ;;  %v1806_v27 = vld [vmem:[%s2649_s1 + $0x1a0] ss:$8 sps:$4 sm:$0xff]  }
  0x63   : > { %670 = vmatpush1.bf16.msra.mxu0 %v1766_v28  ;;  %v254_v28 = vpack.c.bf16 %v218_v25, %v214_v24  ;;  %v219_v24 = vld [vmem:[%s2059_s23 + $0x1b0] sm:$0xff]  ;;  %v224_v25 = vld [vmem:[%s2059_s23 + $0x1d8] sm:$0xff] }
  0x64   : > { %671 = vmatprep.subr.bf16.mxu0 %v1767_v29  ;;  %v1811_v29 = vld [vmem:[%s2649_s1 + $0x1b4] ss:$8 sps:$4 sm:$0xff]  }
  0x67   : > { %672 = vmatpush1.bf16.msra.mxu0 %v1769_v30  ;;  %v1809_v30 = vld [vmem:[%s2649_s1 + $0x1b0] ss:$8 sps:$4 sm:$0xff]  }
  0x68   : > { %673 = vmatprep.subr.bf16.mxu0 %v1770_v31  ;;  %v213_v31 = vld [vmem:[%s2059_s23 + $0x180] sm:$0xff] }
  0x6b   : > { %674 = vmatpush1.bf16.msra.mxu0 %v1772_v32  ;;  %v217_v32 = vld [vmem:[%s2059_s23 + $0x1a0] sm:$0xff] }
  0x6c   : > { %675 = vmatprep.subr.bf16.mxu0 %v1773_v33  ;;  %v1814_v33 = vld [vmem:[%s2649_s1 + $0x1c4] ss:$8 sps:$4 sm:$0xff]   ;;  %v253_v36 = vpack.c.bf16 %v217_v32, %v213_v31 }
  0x6f   : > { %676 = vmatpush1.bf16.msra.mxu0 %v1775_v34  ;;  %v222_v34 = vld [vmem:[%s2059_s23 + $0x1c8] sm:$0xff] }
  0x70   : > { %758 = vmatprep.subr.bf16.mxu0 %v1778_v37  ;;  %v1812_v37 = vld [vmem:[%s2649_s1 + $0x1c0] ss:$8 sps:$4 sm:$0xff]   ;;  %v258_v38 = vpack.c.bf16 %v226_v35, %v222_v34 }
  0x72   : > { %678 = vmatmul.mubr.bf16.vlgmr.msra.gmra.mrb[0].mxu0 %v229_v40  ;;  %v1815_v40 = vld [vmem:[%s2649_s1 + $0x1d0] ss:$8 sps:$4 sm:$0xff]  }
  0x73   : > { %759 = vmatpush1.bf16.msra.mxu0 %v1776_v41  ;;  %687 = vmatprep.mubr.bf16.mxu0 %v234_v42  ;;  %v221_v41 = vld [vmem:[%s2059_s23 + $0x1c0] sm:$0xff] }
  0x74   : > { %760 = vmatprep.subr.bf16.mxu0 %v1781_v43  ;;  %v225_v42 = vld [vmem:[%s2059_s23 + $0x1e0] sm:$0xff] }
  0x75   : > { %v1820_v43 = vld [vmem:[%s2649_s1 + $0x1e4] ss:$8 sps:$4 sm:$0xff]   ;;  %v257_v46 = vpack.c.bf16 %v225_v42, %v221_v41 }
  0x77   : > { %761 = vmatpush1.bf16.msra.mxu0 %v1779_v44  ;;  %v168_v44 = vld [vmem:[%s2059_s23 + $0x18] sm:$0xff] }
  0x78   : > { %762 = vmatprep.subr.bf16.mxu0 %v1784_v47  ;;  %v1818_v47 = vld [vmem:[%s2649_s1 + $0x1e0] ss:$8 sps:$4 sm:$0xff]   ;;  %v232_v48 = vpack.c.bf16 %v172_v45, %v168_v44 }
  0x7a   : > { %688 = vmatmul.mubr.bf16.gmra.mrb[4].mxu0 %v233_v50  ;;  %v1821_v50 = vld [vmem:[%s2649_s1 + $0x1f0] ss:$8 sps:$4 sm:$0xff]  }
  0x7b   : > { %763 = vmatpush1.bf16.msra.mxu0 %v1782_v51  ;;  %697 = vmatprep.mubr.bf16.mxu0 %v238_v52  ;;  %v167_v51 = vld [vmem:[%s2059_s23 + $0x10] sm:$0xff] }
  0x7c   : > { %764 = vmatprep.subr.bf16.mxu0 %v1787_v53  ;;  %v171_v52 = vld [vmem:[%s2059_s23 + $0x30] sm:$0xff]  ;;  %v176_v53 = vld [vmem:[%s2059_s23 + $0x58] sm:$0xff] }
  0x7d   : > { %v231_v55 = vpack.c.bf16 %v171_v52, %v167_v51 }
  0x7f   : > { %765 = vmatpush1.bf16.msra.mxu0 %v1785_v54  ;;  %v180_v54 = vld [vmem:[%s2059_s23 + $0x78] sm:$0xff] }
  0x80   : > { %766 = vmatprep.subr.bf16.mxu0 %v1790_v57  ;;  %v236_v56 = vpack.c.bf16 %v180_v54, %v176_v53  ;;  %v175_v57 = vld [vmem:[%s2059_s23 + $0x50] sm:$0xff] }
  0x82   : > { %698 = vmatmul.mubr.bf16.gmra.mrb[8].mxu0 %v237_v60  ;;  %v188_v60 = vld [vmem:[%s2059_s23 + $0xb8] sm:$0xff] }
  0x83   : > { %767 = vmatpush1.bf16.msra.mxu0 %v1788_v61  ;;  %707 = vmatprep.mubr.bf16.mxu0 %v242_v62  ;;  %v235_v61 = vpack.c.bf16 %v179_v58, %v175_v57  ;;  %v240_v62 = vpack.c.bf16 %v188_v60, %v184_v59 }
  0x84   : > { %768 = vmatprep.subr.bf16.mxu0 %v1793_v63  ;;  %v183_v63 = vld [vmem:[%s2059_s23 + $0x90] sm:$0xff] }
  0x87   : > { %769 = vmatpush1.bf16.msra.mxu0 %v1791_v0  ;;  %v187_v0 = vld [vmem:[%s2059_s23 + $0xb0] sm:$0xff] }
  0x88   : > { %770 = vmatprep.subr.bf16.mxu0 %v1796_v3  ;;  %v239_v3 = vpack.c.bf16 %v187_v0, %v183_v63 }
  0x8a   : > { %708 = vmatmul.mubr.bf16.gmra.mrb[12].mxu0 %v241_v6  ;;  %v195_v6 = vld [vmem:[%s2059_s23 + $0xf0] sm:$0xff] }
  0x8b   : > { %771 = vmatpush1.bf16.msra.mxu0 %v1794_v7  ;;  %717 = vmatprep.mubr.bf16.mxu0 %v246_v8  ;;  %v200_v7 = vld [vmem:[%s2059_s23 + $0x118] sm:$0xff] }
  0x8c   : > { %772 = vmatprep.subr.bf16.mxu0 %v1799_v9  ;;  %v204_v8 = vld [vmem:[%s2059_s23 + $0x138] sm:$0xff]  ;;  %v243_v9 = vpack.c.bf16 %v195_v6, %v191_v5 }
  0x8f   : > { %773 = vmatpush1.bf16.msra.mxu0 %v1797_v10  ;;  %v248_v10 = vpack.c.bf16 %v204_v8, %v200_v7 }
  0x90   : > { %774 = vmatprep.subr.bf16.mxu0 %v1802_v13  ;;  %v208_v13 = vld [vmem:[%s2059_s23 + $0x158] sm:$0xff] }
  0x92   : > { %718 = vmatmul.mubr.bf16.gmra.mrb[16].mxu0 %v245_v16  ;;  %v252_v16 = vpack.c.bf16 %v212_v14, %v208_v13 }
  0x93   : > { %775 = vmatpush1.bf16.msra.mxu0 %v1800_v17  ;;  %727 = vmatprep.mubr.bf16.mxu0 %v250_v18  ;;  %v207_v17 = vld [vmem:[%s2059_s23 + $0x150] sm:$0xff] }
  0x94   : > { %776 = vmatprep.subr.bf16.mxu0 %v1805_v19  ;;  %v211_v18 = vld [vmem:[%s2059_s23 + $0x170] sm:$0xff]  ;;  %v216_v19 = vld [vmem:[%s2059_s23 + $0x198] sm:$0xff] }
  0x95   : > { %v251_v21 = vpack.c.bf16 %v211_v18, %v207_v17 }
  0x97   : > { %777 = vmatpush1.bf16.msra.mxu0 %v1803_v20  ;;  %v220_v20 = vld [vmem:[%s2059_s23 + $0x1b8] sm:$0xff] }
  0x98   : > { %778 = vmatprep.subr.bf16.mxu0 %v1808_v23  ;;  %v256_v22 = vpack.c.bf16 %v220_v20, %v216_v19  ;;  %v215_v23 = vld [vmem:[%s2059_s23 + $0x190] sm:$0xff] }
  0x9a   : > { %728 = vmatmul.mubr.bf16.gmra.mrb[20].mxu0 %v249_v26  ;;  %v228_v26 = vld [vmem:[%s2059_s23 + $0x1f8] sm:$0xff] }
  0x9b   : > { %779 = vmatpush1.bf16.msra.mxu0 %v1806_v27  ;;  %737 = vmatprep.mubr.bf16.mxu0 %v254_v28  ;;  %v255_v27 = vpack.c.bf16 %v219_v24, %v215_v23  ;;  %v260_v28 = vpack.c.bf16 %v228_v26, %v224_v25 }
  0x9c   : > { %780 = vmatprep.subr.bf16.mxu0 %v1811_v29  ;;  %v223_v29 = vld [vmem:[%s2059_s23 + $0x1d0] sm:$0xff] }
  0x9f   : > { %781 = vmatpush1.bf16.msra.mxu0 %v1809_v30  ;;  %v227_v30 = vld [vmem:[%s2059_s23 + $0x1f0] sm:$0xff]  ;;  %s1549_s23 = sshll.u32 %s2659_s13, 7 }
  0xa0   : > { %782 = vmatprep.subr.bf16.mxu0 %v1814_v33  ;;  %v259_v31 = vpack.c.bf16 %v227_v30, %v223_v29  ;;  %s2601_s22 = scalar_lea.vmem %s2650_s2, %s1549_s23 }
  0xa2   : > { %738 = vmatmul.mubr.bf16.gmra.mrb[24].mxu0 %v253_v36 }
  0xa3   : > { %783 = vmatpush1.bf16.msra.mxu0 %v1812_v37  ;;  %747 = vmatprep.mubr.bf16.mxu0 %v258_v38 }
  0xa4   : > { %784 = vmatprep.subr.bf16.mxu0 %v1817_v39 }
  0xa7   : > { %785 = vmatpush1.bf16.msra.mxu0 %v1815_v40 }
  0xa8   : > { %786 = vmatprep.subr.bf16.mxu0 %v1820_v43 }
  0xaa   : > { %748 = vmatmul.mubr.bf16.gmra.mrb[28].mxu0 %v257_v46 }
  0xab   : > { %787 = vmatpush1.bf16.msra.mxu0 %v1818_v47  ;;  %790 = vmatprep.mubr.bf16.mxu0 %v232_v48 }
  0xac   : > { %788 = vmatprep.subr.bf16.mxu0 %v1823_v49 }
  0xaf   : > { %789 = vmatpush1.bf16.msra.mxu0 %v1821_v50 }
  0xb2   : > { %791 = vmatmul.mubr.bf16.vlgmr.msra.gmra.mrb[0].mxu0 %v231_v55 }
  0xb3   : > { %800 = vmatprep.mubr.bf16.mxu0 %v236_v56 }
  0xba   : > { %801 = vmatmul.mubr.bf16.gmra.mrb[4].mxu0 %v235_v61 }
  0xbb   : > { %810 = vmatprep.mubr.bf16.mxu0 %v240_v62 }
  0xc2   : > { %811 = vmatmul.mubr.bf16.gmra.mrb[8].mxu0 %v239_v3 }
  0xc3   : > { %820 = vmatprep.mubr.bf16.mxu0 %v244_v4 }
  0xca   : > { %821 = vmatmul.mubr.bf16.gmra.mrb[12].mxu0 %v243_v9 }
  0xcb   : > { %830 = vmatprep.mubr.bf16.mxu0 %v248_v10 }
  0xd2   : > { %831 = vmatmul.mubr.bf16.gmra.mrb[16].mxu0 %v247_v15 }
  0xd3   : > { %840 = vmatprep.mubr.bf16.mxu0 %v252_v16 }
  0xda   : > { %841 = vmatmul.mubr.bf16.gmra.mrb[20].mxu0 %v251_v21 }
  0xdb   : > { %850 = vmatprep.mubr.bf16.mxu0 %v256_v22 }
  0xe2   : > { %851 = vmatmul.mubr.bf16.gmra.mrb[24].mxu0 %v255_v27 }
  0xe3   : > { %860 = vmatprep.mubr.bf16.mxu0 %v260_v28 }
  0xea   : > { %861 = vmatmul.mubr.bf16.gmra.mrb[28].mxu0 %v259_v31 }
 0x185   : > { %v792_v32 = vpop.f32.mrb[0].mxu0 }
 0x186   : > { %v794_v33 = vpop.f32.mrb[1].mxu0  ;;  %v871_v35 = vmul.f32 0.125, %v792_v32 }
 0x187   : > { %v796_v34 = vpop.f32.mrb[2].mxu0 }
 0x188   : > { %v872_v36 = vmul.f32 0.125, %v796_v34  ;;  %v798_v37 = vpop.f32.mrb[3].mxu0  ;;  %v895_v38 = vpack.c.bf16 %v796_v34, %v792_v32 }
 0x189   : > { %v2321_v39 = vpack.c.bf16 %v798_v37, %v794_v33 }
 0x18a   : > { %911 = vrot.lane.b32.xlu0 %v895_v38, %s1957_s19  ;;  %v887_v40 = vpack.c.bf16 %v872_v36, %v871_v35 }
 0x18c   : > { %1598 = vmatprep.mubr.msk.bf16.mxu1 %vm927_vm0, %v887_v40 }
 0x18d   : > { %v802_v41 = vpop.f32.mrb[4].mxu0 }
 0x18e   : > { %v804_v42 = vpop.f32.mrb[5].mxu0  ;;  %v2325_v44 = vmul.f32 0.125, %v802_v41 }
 0x18f   : > { %v806_v43 = vpop.f32.mrb[6].mxu0 }
 0x190   : > { %v2327_v45 = vmul.f32 0.125, %v806_v43  ;;  %v896_v46 = vpack.c.bf16 %v806_v43, %v802_v41  ;;  %v808_v47 = vpop.f32.mrb[7].mxu0 }
 0x191   : > { %v2329_v48 = vpack.c.bf16 %v808_v47, %v804_v42 }
 0x192   : > { %v888_v49 = vpack.c.bf16 %v2327_v45, %v2325_v44  ;;  %913 = vrot.lane.b32.xlu0 %v896_v46, %s1957_s19 }
 0x195   : > { %v812_v50 = vpop.f32.mrb[8].mxu0 }
 0x196   : > { %v814_v51 = vpop.f32.mrb[9].mxu0  ;;  %v2334_v53 = vmul.f32 0.125, %v812_v50 }
 0x197   : > { %v816_v52 = vpop.f32.mrb[10].mxu0 }
 0x198   : > { %v2336_v54 = vmul.f32 0.125, %v816_v52  ;;  %v818_v55 = vpop.f32.mrb[11].mxu0  ;;  %v897_v56 = vpack.c.bf16 %v816_v52, %v812_v50 }
 0x199   : > { %v2338_v57 = vpack.c.bf16 %v818_v55, %v814_v51 }
 0x19a   : > { %v889_v58 = vpack.c.bf16 %v2336_v54, %v2334_v53  ;;  %915 = vrot.lane.b32.xlu1 %v897_v56, %s1957_s19 }
 0x19d   : > { %v822_v59 = vpop.f32.mrb[12].mxu0 }
 0x19e   : > { %v824_v60 = vpop.f32.mrb[13].mxu0  ;;  %v2343_v62 = vmul.f32 0.125, %v822_v59 }
 0x19f   : > { %v826_v61 = vpop.f32.mrb[14].mxu0 }
 0x1a0   : > { %v2345_v63 = vmul.f32 0.125, %v826_v61  ;;  %v898_v0 = vpack.c.bf16 %v826_v61, %v822_v59  ;;  %v828_v1 = vpop.f32.mrb[15].mxu0 }
 0x1a1   : > { %v2347_v2 = vpack.c.bf16 %v828_v1, %v824_v60 }
 0x1a2   : > { %v890_v3 = vpack.c.bf16 %v2345_v63, %v2343_v62  ;;  %917 = vrot.lane.b32.xlu1 %v898_v0, %s1957_s19 }
 0x1a5   : > { %v832_v4 = vpop.f32.mrb[16].mxu0 }
 0x1a6   : > { %v834_v5 = vpop.f32.mrb[17].mxu0  ;;  %v2352_v7 = vmul.f32 0.125, %v832_v4 }
 0x1a7   : > { %v836_v6 = vpop.f32.mrb[18].mxu0 }
 0x1a8   : > { %v2354_v8 = vmul.f32 0.125, %v836_v6  ;;  %v899_v9 = vpack.c.bf16 %v836_v6, %v832_v4  ;;  %v838_v10 = vpop.f32.mrb[19].mxu0 }
 0x1a9   : > { %v2356_v11 = vpack.c.bf16 %v838_v10, %v834_v5 }
 0x1aa   : > { %v891_v12 = vpack.c.bf16 %v2354_v8, %v2352_v7  ;;  %919 = vrot.lane.b32.xlu0 %v899_v9, %s1957_s19 }
 0x1ad   : > { %v842_v13 = vpop.f32.mrb[20].mxu0 }
 0x1ae   : > { %v844_v14 = vpop.f32.mrb[21].mxu0  ;;  %v2361_v16 = vmul.f32 0.125, %v842_v13 }
 0x1af   : > { %v846_v15 = vpop.f32.mrb[22].mxu0 }
 0x1b0   : > { %v2363_v17 = vmul.f32 0.125, %v846_v15  ;;  %v900_v18 = vpack.c.bf16 %v846_v15, %v842_v13  ;;  %v848_v19 = vpop.f32.mrb[23].mxu0 }
 0x1b1   : > { %v2365_v20 = vpack.c.bf16 %v848_v19, %v844_v14 }
 0x1b2   : > { %v892_v21 = vpack.c.bf16 %v2363_v17, %v2361_v16  ;;  %921 = vrot.lane.b32.xlu1 %v900_v18, %s1957_s19 }
 0x1b5   : > { %v852_v22 = vpop.f32.mrb[24].mxu0 }
 0x1b6   : > { %v854_v23 = vpop.f32.mrb[25].mxu0  ;;  %v2370_v25 = vmul.f32 0.125, %v852_v22 }
 0x1b7   : > { %v856_v24 = vpop.f32.mrb[26].mxu0 }
 0x1b8   : > { %v2372_v26 = vmul.f32 0.125, %v856_v24  ;;  %v901_v27 = vpack.c.bf16 %v856_v24, %v852_v22  ;;  %v858_v28 = vpop.f32.mrb[27].mxu0 }
 0x1b9   : > { %v2374_v29 = vpack.c.bf16 %v858_v28, %v854_v23 }
 0x1ba   : > { %v893_v30 = vpack.c.bf16 %v2372_v26, %v2370_v25  ;;  %923 = vrot.lane.b32.xlu0 %v901_v27, %s1957_s19 }
 0x1bd   : > { %v862_v31 = vpop.f32.mrb[28].mxu0 }
 0x1be   : > { %v864_v32 = vpop.f32.mrb[29].mxu0  ;;  %v885_v34 = vmul.f32 0.125, %v862_v31 }
 0x1bf   : > { %v866_v33 = vpop.f32.mrb[30].mxu0 }
 0x1c0   : > { %v886_v35 = vmul.f32 0.125, %v866_v33  ;;  %v902_v36 = vpack.c.bf16 %v866_v33, %v862_v31  ;;  %v868_v37 = vpop.f32.mrb[31].mxu0 }
 0x1c1   : > { %v1283_v38 = vpack.c.bf16 %v868_v37, %v864_v32 }
 0x1c2   : > { %v894_v40 = vpack.c.bf16 %v886_v35, %v885_v34  ;;  %925 = vrot.lane.b32.xlu1 %v902_v36, %s1957_s19 }
 0x1fc   : > { %v912_v41 = vpop.permute.xlu0 %911 }
 0x1fd   : > { %1678 = vmatprep.subr.msk.bf16.mxu1 %vm927_vm0, %v912_v41  ;;  %v953_v42 = vsel %vm927_vm0, %v912_v41, 0 }
 0x1fe   : > { %1583 = vmatpush3.bf16.xpose.msra.mxu1 %v953_v42 }
 0x204   : > { %v914_v43 = vpop.permute.xlu0 %913 }
 0x205   : > { %1679 = vmatprep.subr.msk.bf16.mxu1 %vm927_vm0, %v914_v43  ;;  %v956_v46 = vsel %vm927_vm0, %v914_v43, 0 }
 0x206   : > { %1585 = vmatpush3.bf16.xpose.msra.mxu1 %v956_v46 }
 0x20c   : > { %v916_v47 = vpop.permute.xlu1 %915 }
 0x20d   : > { %1680 = vmatprep.subr.msk.bf16.mxu1 %vm927_vm0, %v916_v47  ;;  %v959_v50 = vsel %vm927_vm0, %v916_v47, 0 }
 0x20e   : > { %1587 = vmatpush3.bf16.xpose.msra.mxu1 %v959_v50 }
 0x214   : > { %v918_v51 = vpop.permute.xlu1 %917 }
 0x215   : > { %1681 = vmatprep.subr.msk.bf16.mxu1 %vm927_vm0, %v918_v51  ;;  %v962_v52 = vsel %vm927_vm0, %v918_v51, 0 }
 0x216   : > { %1589 = vmatpush3.bf16.xpose.msra.mxu1 %v962_v52 }
 0x21c   : > { %v920_v55 = vpop.permute.xlu0 %919 }
 0x21d   : > { %1682 = vmatprep.subr.msk.bf16.mxu1 %vm927_vm0, %v920_v55  ;;  %v965_v56 = vsel %vm927_vm0, %v920_v55, 0 }
 0x21e   : > { %1591 = vmatpush3.bf16.xpose.msra.mxu1 %v965_v56 }
 0x224   : > { %v922_v59 = vpop.permute.xlu1 %921 }
 0x225   : > { %1683 = vmatprep.subr.msk.bf16.mxu1 %vm927_vm0, %v922_v59  ;;  %v968_v60 = vsel %vm927_vm0, %v922_v59, 0 }
 0x226   : > { %1593 = vmatpush3.bf16.xpose.msra.mxu1 %v968_v60 }
 0x22c   : > { %v924_v61 = vpop.permute.xlu0 %923 }
 0x22d   : > { %1684 = vmatprep.subr.msk.bf16.mxu1 %vm927_vm0, %v924_v61  ;;  %v971_v0 = vsel %vm927_vm0, %v924_v61, 0 }
 0x22e   : > { %1595 = vmatpush3.bf16.xpose.msra.mxu1 %v971_v0 }
 0x234   : > { %v926_v1 = vpop.permute.xlu1 %925 }
 0x235   : > { %1685 = vmatprep.subr.msk.bf16.mxu1 %vm927_vm0, %v926_v1  ;;  %v974_v4 = vsel %vm927_vm0, %v926_v1, 0 }
 0x236   : > { %1597 = vmatpush3.bf16.xpose.msra.mxu1 %v974_v4 }
 0x237   : > { %1614 = vmatprep.subr.bf16.mxu1 %v2321_v39 }
 0x23d   : > { %1599 = vmatmul.mubr.msk.bf16.vlgmr.msra.gmra.mrb[0].mxu1 %vm927_vm0, %v888_v49 }
 0x23e   : > { %1602 = vmatprep.mubr.msk.bf16.mxu1 %vm927_vm0, %v889_v58  ;;  %1615 = vmatpush3.bf16.msra.mxu1 %v2321_v39  ;;  %v1073_v39 = vlaneseq }
 0x23f   : > { %1616 = vmatprep.subr.bf16.mxu1 %v2329_v48 }
 0x240   : > { %v2432_v44 = vshrl.u32 %v1073_v39, 7  ;;  %v2434_v45 = vand.u32 127, %v1073_v39 }
 0x242   : > { %1617 = vmatpush3.bf16.msra.mxu1 %v2329_v48  ;;  %v1075_v48 = vadd.s32 8, %v2432_v44  ;;  %vm1092_vm1 = vcmp.le.s32.totalorder %v2434_v45, %v2432_v44  ;;  %v1076_v49 = vadd.s32 16, %v2432_v44  ;;  %v1077_v63 = vadd.s32 24, %v2432_v44 }
 0x243   : > { %1618 = vmatprep.subr.bf16.mxu1 %v2338_v57  ;;  %v1080_v6 = vadd.s32 48, %v2432_v44  ;;  %v1079_v7 = vadd.s32 40, %v2432_v44  ;;  %v1081_v14 = vadd.s32 56, %v2432_v44  ;;  %v1082_v15 = vadd.s32 64, %v2432_v44 }
 0x244   : > { %vm1093_vm2 = vcmp.le.s32.totalorder %v2434_v45, %v1075_v48  ;;  %vm1094_vm3 = vcmp.le.s32.totalorder %v2434_v45, %v1076_v49  ;;  %vm1095_vm4 = vcmp.le.s32.totalorder %v2434_v45, %v1077_v63  ;;  %v1084_v18 = vadd.s32 80, %v2432_v44 }
 0x245   : > { %1603 = vmatmul.mubr.msk.bf16.gmra.mrb[4].mxu1 %vm927_vm0, %v890_v3  ;;  %vm1098_vm6 = vcmp.le.s32.totalorder %v2434_v45, %v1080_v6  ;;  %vm1097_vm7 = vcmp.le.s32.totalorder %v2434_v45, %v1079_v7  ;;  %vm1099_vm8 = vcmp.le.s32.totalorder %v2434_v45, %v1081_v14  ;;  %vm1100_vm9 = vcmp.le.s32.totalorder %v2434_v45, %v1082_v15 }
 0x246   : > { %1606 = vmatprep.mubr.msk.bf16.mxu1 %vm927_vm0, %v891_v12  ;;  %1619 = vmatpush3.bf16.msra.mxu1 %v2338_v57  ;;  %v1083_v19 = vadd.s32 72, %v2432_v44  ;;  %vm1102_vm10 = vcmp.le.s32.totalorder %v2434_v45, %v1084_v18  ;;  %v1085_v26 = vadd.s32 88, %v2432_v44  ;;  %v1086_v27 = vadd.s32 96, %v2432_v44 }
 0x247   : > { %1620 = vmatprep.subr.bf16.mxu1 %v2347_v2  ;;  %v1087_v31 = vadd.s32 104, %v2432_v44 }
 0x248   : > { %vm1101_vm11 = vcmp.le.s32.totalorder %v2434_v45, %v1083_v19  ;;  %vm1103_vm12 = vcmp.le.s32.totalorder %v2434_v45, %v1085_v26  ;;  %vm1104_vm13 = vcmp.le.s32.totalorder %v2434_v45, %v1086_v27 }
 0x249   : > { %vm1105_vm15 = vcmp.le.s32.totalorder %v2434_v45, %v1087_v31 }
 0x24a   : > { %1621 = vmatpush3.bf16.msra.mxu1 %v2347_v2  ;;  %v1078_v2 = vadd.s32 32, %v2432_v44 }
 0x24b   : > { %1622 = vmatprep.subr.bf16.mxu1 %v2356_v11 }
 0x24c   : > { %vm1096_vm5 = vcmp.le.s32.totalorder %v2434_v45, %v1078_v2 }
 0x24d   : > { %1607 = vmatmul.mubr.msk.bf16.gmra.mrb[8].mxu1 %vm927_vm0, %v892_v21 }
 0x24e   : > { %1610 = vmatprep.mubr.msk.bf16.mxu1 %vm927_vm0, %v893_v30  ;;  %1623 = vmatpush3.bf16.msra.mxu1 %v2356_v11  ;;  %v1088_v30 = vadd.s32 112, %v2432_v44 }
 0x24f   : > { %1624 = vmatprep.subr.bf16.mxu1 %v2365_v20 }
 0x250   : > { %vm1106_vm14 = vcmp.le.s32.totalorder %v2434_v45, %v1088_v30 }
 0x252   : > { %1625 = vmatpush3.bf16.msra.mxu1 %v2365_v20 }
 0x253   : > { %1626 = vmatprep.subr.bf16.mxu1 %v2374_v29 }
 0x255   : > { %1611 = vmatmul.mubr.msk.bf16.gmra.mrb[12].mxu1 %vm927_vm0, %v894_v40 }
 0x256   : > { %1627 = vmatpush3.bf16.msra.mxu1 %v2374_v29 }
 0x257   : > { %1628 = vmatprep.subr.bf16.mxu1 %v1283_v38 }
 0x25a   : > { %1629 = vmatpush3.bf16.msra.mxu1 %v1283_v38  ;;  %v1089_v38 = vadd.s32 120, %v2432_v44 }
 0x310   : > { %v1600_v53 = vpop.f32.mrb[0].mxu1 }
 0x311   : > { %v1010_v54 = vpop.f32.mrb[1].mxu1  ;;  %v2450_v5 = vsel %vm1094_vm3, %v1600_v53, -inf }
 0x312   : > { %v1601_v57 = vpop.f32.mrb[2].mxu1  ;;  %v2441_v58 = vsel %vm1092_vm1, %v1010_v54, -inf  ;;  %vm1107_vm1 = vcmp.le.s32.totalorder %v2434_v45, %v1089_v38 }
 0x313   : > { %1124 = vmax.xlane.f32.xlu0 %v2441_v58  ;;  %v1013_v62 = vpop.f32.mrb[3].mxu1  ;;  %v2457_v11 = vsel %vm1095_vm4, %v1601_v57, -inf }
 0x314   : > { %v2447_v3 = vsel %vm1093_vm2, %v1013_v62, -inf }
 0x315   : > { %1126 = vmax.xlane.f32.xlu1 %v2447_v3 }
 0x317   : > { %1128 = vmax.xlane.f32.xlu0 %v2450_v5 }
 0x318   : > { %v1604_v8 = vpop.f32.mrb[4].mxu1 }
 0x319   : > { %v1026_v9 = vpop.f32.mrb[5].mxu1  ;;  %v2467_v16 = vsel %vm1098_vm6, %v1604_v8, -inf }
 0x31a   : > { %v1605_v10 = vpop.f32.mrb[6].mxu1  ;;  %v2459_v12 = vsel %vm1096_vm5, %v1026_v9, -inf }
 0x31b   : > { %1130 = vmax.xlane.f32.xlu0 %v2457_v11  ;;  %1132 = vmax.xlane.f32.xlu1 %v2459_v12  ;;  %v1029_v13 = vpop.f32.mrb[7].mxu1  ;;  %v2477_v23 = vsel %vm1099_vm8, %v1605_v10, -inf }
 0x31c   : > { %v2469_v17 = vsel %vm1097_vm7, %v1029_v13, -inf }
 0x31f   : > { %1136 = vmax.xlane.f32.xlu1 %v2467_v16  ;;  %1134 = vmax.xlane.f32.xlu0 %v2469_v17 }
 0x320   : > { %v1608_v20 = vpop.f32.mrb[8].mxu1 }
 0x321   : > { %v1042_v21 = vpop.f32.mrb[9].mxu1  ;;  %v2487_v28 = vsel %vm1102_vm10, %v1608_v20, -inf }
 0x322   : > { %v1609_v22 = vpop.f32.mrb[10].mxu1  ;;  %v2479_v24 = vsel %vm1100_vm9, %v1042_v21, -inf }
 0x323   : > { %1138 = vmax.xlane.f32.xlu0 %v2477_v23  ;;  %1140 = vmax.xlane.f32.xlu1 %v2479_v24  ;;  %v1045_v25 = vpop.f32.mrb[11].mxu1  ;;  %v2497_v35 = vsel %vm1103_vm12, %v1609_v22, -inf }
 0x324   : > { %v2489_v29 = vsel %vm1101_vm11, %v1045_v25, -inf }
 0x327   : > { %1144 = vmax.xlane.f32.xlu1 %v2487_v28  ;;  %1142 = vmax.xlane.f32.xlu0 %v2489_v29 }
 0x328   : > { %v1612_v32 = vpop.f32.mrb[12].mxu1 }
 0x329   : > { %v1058_v33 = vpop.f32.mrb[13].mxu1  ;;  %v2506_v40 = vsel %vm1106_vm14, %v1612_v32, -inf }
 0x32a   : > { %v1613_v34 = vpop.f32.mrb[14].mxu1  ;;  %v2499_v36 = vsel %vm1104_vm13, %v1058_v33, -inf }
 0x32b   : > { %1146 = vmax.xlane.f32.xlu0 %v2497_v35  ;;  %1148 = vmax.xlane.f32.xlu1 %v2499_v36  ;;  %v1061_v37 = vpop.f32.mrb[15].mxu1  ;;  %v2513_v42 = vsel %vm1107_vm1, %v1613_v34, -inf }
 0x32c   : > { %v2508_v41 = vsel %vm1105_vm15, %v1061_v37, -inf }
 0x32f   : > { %1152 = vmax.xlane.f32.xlu1 %v2506_v40  ;;  %1150 = vmax.xlane.f32.xlu0 %v2508_v41 }
 0x333   : > { %1154 = vmax.xlane.f32.xlu0 %v2513_v42 }
 0x3a0   : > { %v1125_v43 = vpop.xlane.xlu0 %1124 }
 0x3a1   : > { %v1156_v46 = vsub.f32 %v2441_v58, %v1125_v43 }
 0x3a2   : > { %v1127_v47 = vpop.xlane.xlu1 %1126 }
 0x3a3   : > { %v1172_v50 = vmul.f32 1.442695, %v1156_v46  ;;  %v1157_v51 = vsub.f32 %v2447_v3, %v1127_v47 }
 0x3a4   : > { %v1129_v52 = vpop.xlane.xlu0 %1128 }
 0x3a5   : > { %1824 = vpow2.f32 %v1172_v50  ;;  %v1174_v55 = vmul.f32 1.442695, %v1157_v51  ;;  %v1158_v56 = vsub.f32 %v2450_v5, %v1129_v52 }
 0x3a7   : > { %1826 = vpow2.f32 %v1174_v55  ;;  %v1176_v59 = vmul.f32 1.442695, %v1158_v56 }
 0x3a8   : > { %v1131_v60 = vpop.xlane.xlu0 %1130  ;;  %v1133_v61 = vpop.xlane.xlu1 %1132 }
 0x3a9   : > { %1828 = vpow2.f32 %v1176_v59  ;;  %v1159_v0 = vsub.f32 %v2457_v11, %v1131_v60  ;;  %v1160_v1 = vsub.f32 %v2459_v12, %v1133_v61 }
 0x3ab   : > { %v1178_v4 = vmul.f32 1.442695, %v1159_v0  ;;  %v1180_v39 = vmul.f32 1.442695, %v1160_v1 }
 0x3ac   : > { %v1137_v44 = vpop.xlane.xlu1 %1136  ;;  %v1135_v45 = vpop.xlane.xlu0 %1134 }
 0x3ad   : > { %1830 = vpow2.f32 %v1178_v4  ;;  %v1162_v48 = vsub.f32 %v2467_v16, %v1137_v44  ;;  %v1161_v49 = vsub.f32 %v2469_v17, %v1135_v45 }
 0x3ae   : > { %1832 = vpow2.f32 %v1180_v39 }
 0x3af   : > { %v2523_v53 = vpop.eup %1824  ;;  %v1184_v54 = vmul.f32 1.442695, %v1162_v48  ;;  %v1182_v57 = vmul.f32 1.442695, %v1161_v49 }
 0x3b0   : > { %v1139_v58 = vpop.xlane.xlu0 %1138  ;;  %v1141_v62 = vpop.xlane.xlu1 %1140  ;;  %1204 = vadd.xlane.f32.xlu1 %v2523_v53 }
 0x3b1   : > { %v2526_v63 = vpop.eup %1826  ;;  %1834 = vpow2.f32 %v1184_v54  ;;  %v1163_v2 = vsub.f32 %v2477_v23, %v1139_v58  ;;  %v1164_v3 = vsub.f32 %v2479_v24, %v1141_v62 }
 0x3b2   : > { %1836 = vpow2.f32 %v1182_v57  ;;  %1206 = vadd.xlane.f32.xlu0 %v2526_v63 }
 0x3b3   : > { %v2531_v5 = vpop.eup %1828  ;;  %v1186_v6 = vmul.f32 1.442695, %v1163_v2  ;;  %v1188_v7 = vmul.f32 1.442695, %v1164_v3 }
 0x3b4   : > { %v1145_v8 = vpop.xlane.xlu1 %1144  ;;  %v1143_v9 = vpop.xlane.xlu0 %1142  ;;  %1208 = vadd.xlane.f32.xlu1 %v2531_v5 }
 0x3b5   : > { %1838 = vpow2.f32 %v1186_v6  ;;  %v1166_v10 = vsub.f32 %v2487_v28, %v1145_v8  ;;  %v1165_v11 = vsub.f32 %v2489_v29, %v1143_v9 }
 0x3b6   : > { %1840 = vpow2.f32 %v1188_v7 }
 0x3b7   : > { %v2536_v12 = vpop.eup %1830  ;;  %v1192_v13 = vmul.f32 1.442695, %v1166_v10  ;;  %v1190_v14 = vmul.f32 1.442695, %v1165_v11 }
 0x3b8   : > { %v2538_v15 = vpop.eup %1832  ;;  %v1147_v16 = vpop.xlane.xlu0 %1146  ;;  %1210 = vadd.xlane.f32.xlu0 %v2536_v12 }
 0x3b9   : > { %v1149_v17 = vpop.xlane.xlu1 %1148  ;;  %1842 = vpow2.f32 %v1192_v13  ;;  %v1167_v18 = vsub.f32 %v2497_v35, %v1147_v16  ;;  %1212 = vadd.xlane.f32.xlu1 %v2538_v15 }
 0x3ba   : > { %v1168_v19 = vsub.f32 %v2499_v36, %v1149_v17  ;;  %1844 = vpow2.f32 %v1190_v14 }
 0x3bb   : > { %v2544_v20 = vpop.eup %1834  ;;  %v1194_v21 = vmul.f32 1.442695, %v1167_v18 }
 0x3bc   : > { %v1196_v22 = vmul.f32 1.442695, %v1168_v19  ;;  %v2546_v23 = vpop.eup %1836  ;;  %v1151_v25 = vpop.xlane.xlu0 %1150 }
 0x3bd   : > { %v1153_v24 = vpop.xlane.xlu1 %1152  ;;  %1846 = vpow2.f32 %v1194_v21  ;;  %1216 = vadd.xlane.f32.xlu1 %v2544_v20  ;;  %1214 = vadd.xlane.f32.xlu0 %v2546_v23  ;;  %v1169_v27 = vsub.f32 %v2508_v41, %v1151_v25 }
 0x3be   : > { %v1170_v26 = vsub.f32 %v2506_v40, %v1153_v24  ;;  %1848 = vpow2.f32 %v1196_v22 }
 0x3bf   : > { %v2552_v28 = vpop.eup %1838  ;;  %v1198_v30 = vmul.f32 1.442695, %v1169_v27 }
 0x3c0   : > { %v1200_v29 = vmul.f32 1.442695, %v1170_v26  ;;  %v2554_v31 = vpop.eup %1840  ;;  %v1155_v32 = vpop.xlane.xlu0 %1154 }
 0x3c1   : > { %1220 = vadd.xlane.f32.xlu1 %v2554_v31  ;;  %1218 = vadd.xlane.f32.xlu0 %v2552_v28  ;;  %v1171_v33 = vsub.f32 %v2513_v42, %v1155_v32 }
 0x3c2   : > { %1850 = vpow2.f32 %v1200_v29 }
 0x3c3   : > { %1852 = vpow2.f32 %v1198_v30  ;;  %v2559_v34 = vpop.eup %1842  ;;  %v1202_v35 = vmul.f32 1.442695, %v1171_v33 }
 0x3c4   : > { %v2561_v36 = vpop.eup %1844 }
 0x3c5   : > { %1854 = vpow2.f32 %v1202_v35  ;;  %1224 = vadd.xlane.f32.xlu1 %v2559_v34  ;;  %1222 = vadd.xlane.f32.xlu0 %v2561_v36 }
 0x3c7   : > { %v2565_v37 = vpop.eup %1846 }
 0x3c8   : > { %v2567_v38 = vpop.eup %1848 }
 0x3c9   : > { %1228 = vadd.xlane.f32.xlu1 %v2567_v38  ;;  %1226 = vadd.xlane.f32.xlu0 %v2565_v37 }
 0x3cc   : > { %v2571_v40 = vpop.eup %1850 }
 0x3cd   : > { %v2573_v41 = vpop.eup %1852  ;;  %1232 = vadd.xlane.f32.xlu1 %v2571_v40 }
 0x3ce   : > { %1230 = vadd.xlane.f32.xlu0 %v2573_v41 }
 0x3cf   : > { %v2577_v42 = vpop.eup %1854 }
 0x3d2   : > { %1234 = vadd.xlane.f32.xlu0 %v2577_v42 }
 0x43d   : > { %v1205_v43 = vpop.xlane.xlu1 %1204 }
 0x43e   : > { %1856 = vrcp.f32 %v1205_v43 }
 0x43f   : > { %v1207_v46 = vpop.xlane.xlu0 %1206 }
 0x440   : > { %1858 = vrcp.f32 %v1207_v46 }
 0x441   : > { %v1209_v47 = vpop.xlane.xlu1 %1208 }
 0x442   : > { %1860 = vrcp.f32 %v1209_v47 }
 0x445   : > { %v1211_v50 = vpop.xlane.xlu0 %1210 }
 0x446   : > { %v1213_v51 = vpop.xlane.xlu1 %1212  ;;  %1862 = vrcp.f32 %v1211_v50 }
 0x447   : > { %1864 = vrcp.f32 %v1213_v51 }
 0x448   : > { %v1857_v52 = vpop.eup %1856 }
 0x449   : > { %v1252_v60 = vmul.f32 %v1857_v52, %v2523_v53 }
 0x44a   : > { %v1859_v55 = vpop.eup %1858  ;;  %v1217_v56 = vpop.xlane.xlu1 %1216 }
 0x44b   : > { %v1215_v59 = vpop.xlane.xlu0 %1214  ;;  %v1253_v61 = vmul.f32 %v1859_v55, %v2526_v63 }
 0x44c   : > { %1866 = vrcp.f32 %v1215_v59  ;;  %v1861_v1 = vpop.eup %1860 }
 0x44d   : > { %v1268_v0 = vpack.c.bf16 %v1253_v61, %v1252_v60  ;;  %1868 = vrcp.f32 %v1217_v56  ;;  %v1254_v45 = vmul.f32 %v1861_v1, %v2531_v5 }
 0x44e   : > { %v1221_v4 = vpop.xlane.xlu1 %1220 }
 0x44f   : > { %v1219_v39 = vpop.xlane.xlu0 %1218  ;;  %1630 = vmatprep.mubr.bf16.mxu1 %v1268_v0 }
 0x450   : > { %v1863_v44 = vpop.eup %1862  ;;  %1870 = vrcp.f32 %v1219_v39 }
 0x451   : > { %v1255_v48 = vmul.f32 %v1863_v44, %v2536_v12  ;;  %1872 = vrcp.f32 %v1221_v4  ;;  %v1865_v53 = vpop.eup %1864 }
 0x452   : > { %v1225_v49 = vpop.xlane.xlu1 %1224  ;;  %v1256_v2 = vmul.f32 %v1865_v53, %v2538_v15 }
 0x453   : > { %v1223_v54 = vpop.xlane.xlu0 %1222  ;;  %v1269_v57 = vpack.c.bf16 %v1255_v48, %v1254_v45 }
 0x454   : > { %1874 = vrcp.f32 %v1223_v54 }
 0x455   : > { %1631 = vmatmul.mubr.bf16.vlgmr.msra.gmra.mrb[16].mxu1 %v1269_v57  ;;  %1876 = vrcp.f32 %v1225_v49 }
 0x456   : > { %v1867_v58 = vpop.eup %1866  ;;  %v1229_v62 = vpop.xlane.xlu1 %1228 }
 0x457   : > { %v1227_v63 = vpop.xlane.xlu0 %1226  ;;  %v1257_v3 = vmul.f32 %v1867_v58, %v2546_v23  ;;  %v1869_v6 = vpop.eup %1868 }
 0x458   : > { %1878 = vrcp.f32 %v1227_v63  ;;  %v1258_v10 = vmul.f32 %v1869_v6, %v2544_v20 }
 0x459   : > { %v1270_v5 = vpack.c.bf16 %v1257_v3, %v1256_v2  ;;  %1880 = vrcp.f32 %v1229_v62 }
 0x45a   : > { %v1871_v7 = vpop.eup %1870  ;;  %v1233_v8 = vpop.xlane.xlu1 %1232 }
 0x45b   : > { %v1231_v9 = vpop.xlane.xlu0 %1230  ;;  %1634 = vmatprep.mubr.bf16.mxu1 %v1270_v5  ;;  %v1259_v11 = vmul.f32 %v1871_v7, %v2552_v28  ;;  %v1873_v12 = vpop.eup %1872 }
 0x45c   : > { %1882 = vrcp.f32 %v1231_v9  ;;  %v1260_v16 = vmul.f32 %v1873_v12, %v2554_v31 }
 0x45d   : > { %1884 = vrcp.f32 %v1233_v8  ;;  %v1271_v13 = vpack.c.bf16 %v1259_v11, %v1258_v10 }
 0x45e   : > { %v1875_v14 = vpop.eup %1874 }
 0x45f   : > { %v1235_v15 = vpop.xlane.xlu0 %1234  ;;  %1635 = vmatmul.mubr.bf16.gmra.mrb[20].mxu1 %v1271_v13  ;;  %v1261_v17 = vmul.f32 %v1875_v14, %v2561_v36  ;;  %v1877_v18 = vpop.eup %1876 }
 0x460   : > { %1886 = vrcp.f32 %v1235_v15  ;;  %v1262_v20 = vmul.f32 %v1877_v18, %v2559_v34 }
 0x461   : > { %v1272_v19 = vpack.c.bf16 %v1261_v17, %v1260_v16 }
 0x462   : > { %v1879_v21 = vpop.eup %1878 }
 0x463   : > { %1638 = vmatprep.mubr.bf16.mxu1 %v1272_v19  ;;  %v1263_v22 = vmul.f32 %v1879_v21, %v2565_v37  ;;  %v1881_v23 = vpop.eup %1880 }
 0x464   : > { %v1264_v27 = vmul.f32 %v1881_v23, %v2567_v38 }
 0x465   : > { %v1273_v24 = vpack.c.bf16 %v1263_v22, %v1262_v20 }
 0x466   : > { %v1883_v25 = vpop.eup %1882 }
 0x467   : > { %v1885_v26 = vpop.eup %1884  ;;  %1639 = vmatmul.mubr.bf16.gmra.mrb[24].mxu1 %v1273_v24  ;;  %v1265_v28 = vmul.f32 %v1883_v25, %v2573_v41 }
 0x468   : > { %v1266_v31 = vmul.f32 %v1885_v26, %v2571_v40 }
 0x469   : > { %v1274_v30 = vpack.c.bf16 %v1265_v28, %v1264_v27 }
 0x46a   : > { %v1887_v29 = vpop.eup %1886 }
 0x46b   : > { %v1267_v32 = vmul.f32 %v1887_v29, %v2577_v42  ;;  %1642 = vmatprep.mubr.bf16.mxu1 %v1274_v30 }
 0x46d   : > { %v1275_v33 = vpack.c.bf16 %v1267_v32, %v1266_v31 }
 0x46f   : > { %1643 = vmatmul.mubr.bf16.gmra.mrb[28].mxu1 %v1275_v33 }
 0x528   : > { %v1632_v34 = vpop.f32.mrb[16].mxu1 }
 0x529   : > { %1383 = vst.msk [vmem:[%s2601_s22 + $0x10] sm:$0xff] %vm927_vm0, %v1632_v34  ;;  %v1318_v35 = vpop.f32.mrb[17].mxu1 }
 0x52a   : > { %1381 = vst.msk [vmem:[%s2601_s22] sm:$0xff] %vm927_vm0, %v1318_v35  ;;  %v1633_v36 = vpop.f32.mrb[18].mxu1 }
 0x52b   : > { %1384 = vst.msk [vmem:[%s2601_s22 + $0x18] sm:$0xff] %vm927_vm0, %v1633_v36  ;;  %v1321_v37 = vpop.f32.mrb[19].mxu1 }
 0x52c   : > { %1382 = vst.msk [vmem:[%s2601_s22 + $0x8] sm:$0xff] %vm927_vm0, %v1321_v37 }
 0x532   : > { %v1636_v38 = vpop.f32.mrb[20].mxu1 }
 0x533   : > { %1387 = vst.msk [vmem:[%s2601_s22 + $0x30] sm:$0xff] %vm927_vm0, %v1636_v38  ;;  %v1334_v40 = vpop.f32.mrb[21].mxu1 }
 0x534   : > { %1385 = vst.msk [vmem:[%s2601_s22 + $0x20] sm:$0xff] %vm927_vm0, %v1334_v40  ;;  %v1637_v41 = vpop.f32.mrb[22].mxu1 }
 0x535   : > { %1388 = vst.msk [vmem:[%s2601_s22 + $0x38] sm:$0xff] %vm927_vm0, %v1637_v41  ;;  %v1337_v42 = vpop.f32.mrb[23].mxu1 }
 0x536   : > { %1386 = vst.msk [vmem:[%s2601_s22 + $0x28] sm:$0xff] %vm927_vm0, %v1337_v42 }
 0x53a   : > { %v1640_v43 = vpop.f32.mrb[24].mxu1 }
 0x53b   : > { %1391 = vst.msk [vmem:[%s2601_s22 + $0x50] sm:$0xff] %vm927_vm0, %v1640_v43  ;;  %v1350_v46 = vpop.f32.mrb[25].mxu1 }
 0x53c   : > { %1389 = vst.msk [vmem:[%s2601_s22 + $0x40] sm:$0xff] %vm927_vm0, %v1350_v46  ;;  %v1641_v47 = vpop.f32.mrb[26].mxu1 }
 0x53d   : > { %1392 = vst.msk [vmem:[%s2601_s22 + $0x58] sm:$0xff] %vm927_vm0, %v1641_v47  ;;  %v1353_v50 = vpop.f32.mrb[27].mxu1 }
 0x53e   : > { %1390 = vst.msk [vmem:[%s2601_s22 + $0x48] sm:$0xff] %vm927_vm0, %v1353_v50 }
 0x542   : > { %v1644_v51 = vpop.f32.mrb[28].mxu1 }
 0x543   : > { %1395 = vst.msk [vmem:[%s2601_s22 + $0x70] sm:$0xff] %vm927_vm0, %v1644_v51  ;;  %v1366_v52 = vpop.f32.mrb[29].mxu1 }
 0x544   : > { %1393 = vst.msk [vmem:[%s2601_s22 + $0x60] sm:$0xff] %vm927_vm0, %v1366_v52  ;;  %v1645_v55 = vpop.f32.mrb[30].mxu1 }
 0x545   : > { %1396 = vst.msk [vmem:[%s2601_s22 + $0x78] sm:$0xff] %vm927_vm0, %v1645_v55  ;;  %v1369_v56 = vpop.f32.mrb[31].mxu1 }
 0x546   : > { %1394 = vst.msk [vmem:[%s2601_s22 + $0x68] sm:$0xff] %vm927_vm0, %v1369_v56 }
 0x547 PF: > { %p12_p8 = scmp.ge.s32.totalorder %s1995_s14, 4   ;;  %s2654_s9 = smov %s1944_s10 }
 0x548   : > { %s2655_s10 = smov %s1948_s11  ;;  %s2656_s11 = smov %s2005_s17 }
 0x549   : > { %s2657_s12 = smov %s1995_s14  ;;  %14 = sbr.rel (!%p12_p8) target bundleno = 3 (0x3), region = 68 }
 0x550   :  { %1418 = vsyncpa [#allocation3], 1 }
 0x551   :  { %1420 = vsyncpa [#allocation3 + $0x1], 1 }

</bundles_post_ra>
